<compile_context>
chip_gen: v6e
topology: v6e:2x2x1
jax: 0.10.0
libtpu: 0.0.40
codegen_flags: <defaults>
</compile_context>

<pallas_src>
import functools

import jax
import jax.numpy as jnp
import numpy as np
from jax.experimental import pallas as pl
from jax.experimental.pallas import tpu as pltpu


def _round_up(x, m):
    return ((x + m - 1) // m) * m


# ----------------------------- kernel ---------------------------------------
def _interactor_kernel(pos_ref, bias_ref, xeo_ref, w1a_ref, w2a_ref,
                       w1c_ref, w2d_ref, out_ref, *,
                       C, L, L1, K, PAD, NT, compute_dtype):
    """One batch tile.  All operands are 2-D: rows = stacked channels, lanes =
    (batch-in-tile, position) at a uniform per-batch stride of L1, zero-padded
    to NT lanes (multiple of 128) so every load/store is lane-dense/aligned."""
    pos = pos_ref[...]            # (1, NT) int32, per-segment position (>= L1 on pad lanes)
    bias_f32 = bias_ref[...]      # (8, NT) f32, row 0 = 1, rows 1..7 = 0 (augmented-bias block)

    def lroll(a, shift):          # lane roll: result[t] = a[t - shift]
        return pltpu.roll(a, shift % NT, axis=1)

    def leaky(a):                 # LeakyReLU(negative_slope=0.01)
        return jnp.where(a > 0, a, 0.01 * a)

    def conv1_taps(r0):
        """r0[p] = v[min(p, L-1)] (right-clamped base).  Returns the K taps
        T_j[p] = v[clamp(p + j - PAD, 0, L-1)], j = 0..K-1, built from lane
        rolls + position-mask edge replication (ReplicationPad1d semantics)."""
        smax = K - 1 - PAD
        pos_taps = [r0]
        for s in range(1, smax + 1):
            pos_taps.append(jnp.where(pos <= L - 1 - s, lroll(r0, -s), pos_taps[-1]))
        neg_taps = [r0]
        for m in range(1, PAD + 1):
            neg_taps.append(jnp.where(pos >= m, lroll(r0, m), neg_taps[-1]))
        return neg_taps[PAD:0:-1] + pos_taps[:smax + 1]      # ordered j = 0 .. K-1

    def branch_pair(r0, w1_ref, w2_ref):
        """Fused pair of branches (block-structured augmented weights):
        Tanh(Conv1d_3(LeakyReLU(Conv1d_K(ReplicationPad1d(.)))))."""
        col1 = jnp.concatenate(conv1_taps(r0) + [bias_f32], axis=0)     # (K*2C+8, NT) f32
        h = jnp.dot(w1_ref[...], col1.astype(compute_dtype),
                    preferred_element_type=jnp.float32)                 # (H2, NT) f32
        h = leaky(h)
        col2 = jnp.concatenate([h, lroll(h, -1), lroll(h, -2), bias_f32], axis=0)
        z = jnp.dot(w2_ref[...], col2.astype(compute_dtype),
                    preferred_element_type=jnp.float32)                 # (2C, NT) f32
        return jnp.tanh(z)

    # ---- branch pair 1: phi(x_even) / psi(x_odd) ----------------------------
    xeo = xeo_ref[...]                              # (2C, NT) f32, [xe ; xo], right-edge-filled
    br1 = branch_pair(xeo, w1a_ref, w2a_ref)        # [phi(xe) ; psi(xo)]
    xoe = pltpu.roll(xeo, C, axis=0)                # sublane swap -> [xo ; xe]
    dc = xoe * jnp.exp(br1)                         # [d ; c]  (f32)

    # ---- branch pair 2: U(d) / P(c) -----------------------------------------
    r0 = dc
    for t in range(L1 - L):                         # fill tail lanes with v[L-1]
        r0 = jnp.where(pos <= L - 1 + t, r0, lroll(r0, 1))
    br2 = branch_pair(r0, w1c_ref, w2d_ref)         # [U(d) ; -P(c)]  (P sign folded in weights)

    # ---- combine: [c + U(d) ; d - P(c)] -------------------------------------
    out_ref[...] = pltpu.roll(dc, C, axis=0) + br2


# ------------------------ weight packing (wrapper) ---------------------------
def _pack_conv1_pair(wA, bA, wB, bB, *, C, CH, K, R2, H2, dtype):
    # Augmented, block-structured weight for the fused (branchA, branchB) K-tap
    # conv1: rows [0,CH) use branch-A input rows, rows [CH,2CH) branch-B rows,
    # bias in the augmented column K*R2.
    W = jnp.zeros((H2, K * R2 + 8), jnp.float32)
    for j in range(K):
        W = W.at[0:CH, j * R2:j * R2 + C].set(wA[:, :, j])
        W = W.at[CH:2 * CH, j * R2 + C:j * R2 + 2 * C].set(wB[:, :, j])
    W = W.at[0:CH, K * R2].set(bA)
    W = W.at[CH:2 * CH, K * R2].set(bB)
    return W.astype(dtype)


def _pack_conv2_pair(wA, bA, wB, bB, *, C, CH, R2, H2, dtype, sign_b=1.0):
    W = jnp.zeros((R2, 3 * H2 + 8), jnp.float32)
    for j in range(3):
        W = W.at[0:C, j * H2:j * H2 + CH].set(wA[:, :, j])
        W = W.at[C:2 * C, j * H2 + CH:j * H2 + 2 * CH].set(sign_b * wB[:, :, j])
    W = W.at[0:C, 3 * H2].set(bA)
    W = W.at[C:2 * C, 3 * H2].set(sign_b * bB)
    return W.astype(dtype)


# ------------------------------ wrapper --------------------------------------
def interactor_level_forward(x, params, *, K, batch_tile=None,
                             compute_dtype=jnp.bfloat16):
    """x: (B, T, C) f32.  params use PyTorch Conv1d layouts, branches stacked as
    [phi, psi, U, P]:
        w1: (4, CH, C, K)   b1: (4, CH)
        w2: (4, C, CH, 3)   b2: (4, C)
    Returns (x_even_update, x_odd_update), each (B, C, T//2)."""
    w1, b1, w2, b2 = params
    B, T, C = x.shape
    assert T % 2 == 0, "even/odd split needs an even sequence length"
    assert K % 2 == 1, "kernel-3 second conv only recovers L=T//2 for odd args.kernel"
    assert (2 * C) % 8 == 0, "stacked channel rows must be 8-sublane aligned"
    L = T // 2
    PAD = (K - 1) // 2 + 1
    L1 = L + 2 * PAD - K + 1                  # == L + 2 for odd K
    CH = w1.shape[1]
    R2 = 2 * C
    H2 = _round_up(2 * CH, 8)

    # ---- batch-tile geometry (n_tiles >= 2 when possible; VMEM-budgeted) ----
    cbytes = jnp.dtype(compute_dtype).itemsize
    per_lane = (4 * 4 * R2                            # xeo + out, double-buffered
                + 4 * (2 * H2 + 3 * R2)               # live f32 intermediates
                + 4 * (K * R2 + 3 * H2 + 16)          # f32 cols before the cast
                + cbytes * (K * R2 + 3 * H2 + 16))    # cast cols feeding the MXU
    per_batch_bytes = per_lane * L1

    if batch_tile is None:
        budget = 8 * 1024 * 1024
        BT = 1
        for d in sorted((d for d in range(1, B + 1) if B % d == 0), reverse=True):
            if B >= 2 and B // d < 2:
                continue                      # keep >=2 grid steps (pipelining / 2 TCs)
            if d * per_batch_bytes <= budget:
                BT = d
                break
    else:
        BT = batch_tile
    assert B % BT == 0
    n_tiles = B // BT
    NT = _round_up(BT * L1, 128)              # lane-dense, 128-aligned tile width

    # ---- layout plumbing (plain JAX, outside the kernel) --------------------
    xe = jnp.transpose(x[:, ::2, :], (2, 0, 1)).astype(jnp.float32)    # (C, B, L)
    xo = jnp.transpose(x[:, 1::2, :], (2, 0, 1)).astype(jnp.float32)   # (C, B, L)

    def lay_out(v):  # (C, B, L) -> (C, n_tiles, NT): right-edge fill to L1, zero pad to NT
        v = jnp.pad(v, ((0, 0), (0, 0), (0, L1 - L)), mode="edge")
        v = v.reshape(C, n_tiles, BT * L1)
        return jnp.pad(v, ((0, 0), (0, 0), (0, NT - BT * L1)))

    xeo = jnp.concatenate([lay_out(xe), lay_out(xo)], axis=0).reshape(R2, n_tiles * NT)

    pos_tile = jnp.tile(jnp.arange(L1, dtype=jnp.int32), BT)
    pos = jnp.pad(pos_tile, (0, NT - BT * L1), constant_values=L1).reshape(1, NT)
    bias_blk = jnp.zeros((8, NT), jnp.float32).at[0, :].set(1.0)

    w1a = _pack_conv1_pair(w1[0], b1[0], w1[1], b1[1], C=C, CH=CH, K=K, R2=R2, H2=H2,
                           dtype=compute_dtype)
    w1c = _pack_conv1_pair(w1[2], b1[2], w1[3], b1[3], C=C, CH=CH, K=K, R2=R2, H2=H2,
                           dtype=compute_dtype)
    w2a = _pack_conv2_pair(w2[0], b2[0], w2[1], b2[1], C=C, CH=CH, R2=R2, H2=H2,
                           dtype=compute_dtype)
    # P-branch sign folded into its conv-2 weights/bias: d - tanh(z) == d + tanh(-z)
    w2d = _pack_conv2_pair(w2[2], b2[2], w2[3], b2[3], C=C, CH=CH, R2=R2, H2=H2,
                           dtype=compute_dtype, sign_b=-1.0)

    kernel = functools.partial(_interactor_kernel, C=C, L=L, L1=L1, K=K, PAD=PAD,
                               NT=NT, compute_dtype=compute_dtype)

    const2 = lambda shape: pl.BlockSpec(shape, lambda i: (0, 0))
    in_specs = [
        const2((1, NT)),                              # pos (identical for every tile)
        const2((8, NT)),                              # augmented-bias block
        pl.BlockSpec((R2, NT), lambda i: (0, i)),     # xeo
        const2(w1a.shape), const2(w2a.shape),
        const2(w1c.shape), const2(w2d.shape),
    ]
    out_spec = pl.BlockSpec((R2, NT), lambda i: (0, i))

    flops = int(4 * n_tiles * NT * (H2 * (K * R2 + 8) + R2 * (3 * H2 + 8)))
    cost = pl.CostEstimate(
        flops=flops,
        transcendentals=int(3 * R2 * n_tiles * NT),   # exp + 2 tanh stages per element
        bytes_accessed=int(xeo.size * 4 + R2 * n_tiles * NT * 4
                           + (w1a.size + w2a.size + w1c.size + w2d.size) * cbytes
                           + pos.size * 4 + bias_blk.size * 4))

    step_bytes = int(BT * per_batch_bytes
                     + 2 * (w1a.size + w2a.size + w1c.size + w2d.size) * cbytes)
    vmem_limit = int(min(64 * 2 ** 20, max(16 * 2 ** 20, 4 * step_bytes)))  # v7x-safe

    out2d = pl.pallas_call(
        kernel,
        out_shape=jax.ShapeDtypeStruct((R2, n_tiles * NT), jnp.float32),
        grid_spec=pltpu.PrefetchScalarGridSpec(
            num_scalar_prefetch=0,
            grid=(n_tiles,),
            in_specs=in_specs,
            out_specs=out_spec,
        ),
        compiler_params=pltpu.CompilerParams(
            dimension_semantics=("parallel",),        # batch tiles are independent
            vmem_limit_bytes=vmem_limit),
        cost_estimate=cost,
    )(pos, bias_blk, xeo, w1a, w2a, w1c, w2d)

    # Back to the module's (B, C, T//2) output layout.
    out = out2d.reshape(2, C, n_tiles, NT)[:, :, :, :BT * L1]
    out = out.reshape(2, C, n_tiles, BT, L1)[..., :L]
    out = jnp.transpose(out, (0, 2, 3, 1, 4)).reshape(2, B, C, L)
    return out[0], out[1]


# ---------------- pure-JAX reference (for correctness check) -----------------
def _branch_ref(v, w1, b1, w2, b2, PAD):
    # v: (B, C, L); w1: (CH, C, K); w2: (C, CH, 3)  (PyTorch OIH layouts)
    vp = jnp.pad(v, ((0, 0), (0, 0), (PAD, PAD)), mode="edge")
    y = jax.lax.conv_general_dilated(vp, w1, (1,), "VALID",
                                     dimension_numbers=("NCH", "OIH", "NCH"))
    y = y + b1[None, :, None]
    y = jnp.where(y > 0, y, 0.01 * y)
    z = jax.lax.conv_general_dilated(y, w2, (1,), "VALID",
                                     dimension_numbers=("NCH", "OIH", "NCH"))
    z = z + b2[None, :, None]
    return jnp.tanh(z)


def interactor_level_reference(x, params, *, K):
    w1, b1, w2, b2 = params
    PAD = (K - 1) // 2 + 1
    xe = jnp.transpose(x[:, ::2, :], (0, 2, 1))
    xo = jnp.transpose(x[:, 1::2, :], (0, 2, 1))

    def br(i, v):
        return _branch_ref(v, w1[i], b1[i], w2[i], b2[i], PAD)

    d = xo * jnp.exp(br(0, xe))
    c = xe * jnp.exp(br(1, xo))
    return c + br(2, d), d - br(3, c)


if __name__ == "__main__":
    # args: kernel=5, hidden_size=2, groups=1, dropout (eval -> identity)
    B, T, C = 2, 16, 4           # batch, seq length, in_planes
    K = 5
    HIDDEN = 2
    CH = C * HIDDEN              # 8

    key = jax.random.PRNGKey(0)
    k_x, k_w1, k_b1, k_w2, k_b2 = jax.random.split(key, 5)

    x = jax.random.normal(k_x, (B, T, C), dtype=jnp.float32)

    # 4 branches stacked along axis 0: [phi, psi, U, P]; PyTorch Conv1d layouts.
    w1 = 0.1 * jax.random.normal(k_w1, (4, CH, C, K), dtype=jnp.float32)
    b1 = 0.1 * jax.random.normal(k_b1, (4, CH), dtype=jnp.float32)
    w2 = 0.1 * jax.random.normal(k_w2, (4, C, CH, 3), dtype=jnp.float32)
    b2 = 0.1 * jax.random.normal(k_b2, (4, C), dtype=jnp.float32)
    params = (w1, b1, w2, b2)

    ref_even, ref_odd = interactor_level_reference(x, params, K=K)

    # Exact path (f32 MXU inputs): validates layout / taps / weight packing.
    f32_even, f32_odd = jax.block_until_ready(
        interactor_level_forward(x, params, K=K, compute_dtype=jnp.float32))
    np.testing.assert_allclose(np.asarray(f32_even), np.asarray(ref_even),
                               rtol=1e-4, atol=1e-4)
    np.testing.assert_allclose(np.asarray(f32_odd), np.asarray(ref_odd),
                               rtol=1e-4, atol=1e-4)

    # Default fast path: bf16 MXU inputs with f32 accumulation; looser tolerance
    # accounts for bf16 rounding of weights/activations feeding exp()/tanh().
    out_even, out_odd = jax.block_until_ready(
        interactor_level_forward(x, params, K=K))
    np.testing.assert_allclose(np.asarray(out_even), np.asarray(ref_even),
                               rtol=3e-2, atol=3e-2)
    np.testing.assert_allclose(np.asarray(out_odd), np.asarray(ref_odd),
                               rtol=3e-2, atol=3e-2)
    print("KERNEL_OK")
</pallas_src>

<mosaic_0001>
module attributes {stable_mosaic.version = 11 : i64} {
  func.func @_interactor_kernel(%arg0: i32, %arg1: memref<1x128xi32, #tpu.memory_space<vmem>>, %arg2: memref<8x128xf32, #tpu.memory_space<vmem>>, %arg3: memref<8x128xf32, #tpu.memory_space<vmem>>, %arg4: memref<16x48xf32, #tpu.memory_space<vmem>>, %arg5: memref<8x56xf32, #tpu.memory_space<vmem>>, %arg6: memref<16x48xf32, #tpu.memory_space<vmem>>, %arg7: memref<8x56xf32, #tpu.memory_space<vmem>>, %arg8: memref<8x128xf32, #tpu.memory_space<vmem>>) attributes {dimension_semantics = [#tpu.dimension_semantics<parallel>], iteration_bounds = array<i64: 2>, scalar_prefetch = 0 : i64, scratch_operands = 0 : i64, tpu.core_type = #tpu.core_type<tc>, window_params = [{pipeline_mode = #tpu.pipeline_mode<synchronous>, transform_indices = @transform_0, window_bounds = array<i64: 1, 128>}, {pipeline_mode = #tpu.pipeline_mode<synchronous>, transform_indices = @transform_1, window_bounds = array<i64: 8, 128>}, {transform_indices = @transform_2, window_bounds = array<i64: 8, 128>}, {pipeline_mode = #tpu.pipeline_mode<synchronous>, transform_indices = @transform_3, window_bounds = array<i64: 16, 48>}, {pipeline_mode = #tpu.pipeline_mode<synchronous>, transform_indices = @transform_4, window_bounds = array<i64: 8, 56>}, {pipeline_mode = #tpu.pipeline_mode<synchronous>, transform_indices = @transform_5, window_bounds = array<i64: 16, 48>}, {pipeline_mode = #tpu.pipeline_mode<synchronous>, transform_indices = @transform_6, window_bounds = array<i64: 8, 56>}, {transform_indices = @transform_7, window_bounds = array<i64: 8, 128>}]} {
    %c0 = arith.constant 0 : index
    %c0_0 = arith.constant 0 : index
    %0 = vector.load %arg1[%c0, %c0_0] : memref<1x128xi32, #tpu.memory_space<vmem>>, vector<1x128xi32>
    %c0_1 = arith.constant 0 : index
    %c0_2 = arith.constant 0 : index
    %1 = vector.load %arg2[%c0_1, %c0_2] : memref<8x128xf32, #tpu.memory_space<vmem>>, vector<8x128xf32>
    %c0_3 = arith.constant 0 : index
    %c0_4 = arith.constant 0 : index
    %2 = vector.load %arg3[%c0_3, %c0_4] : memref<8x128xf32, #tpu.memory_space<vmem>>, vector<8x128xf32>
    %c6_i32 = arith.constant 6 : i32
    %3 = vector.broadcast %c6_i32 : i32 to vector<1x128xi32>
    %4 = arith.cmpi sle, %0, %3 : vector<1x128xi32>
    %c127_i32 = arith.constant 127 : i32
    %5 = tpu.dynamic_rotate %2 by %c127_i32 dim 1 : vector<8x128xf32>, i32 -> vector<8x128xf32>
    %6 = vector.shape_cast %4 : vector<1x128xi1> to vector<1x128xi1>
    %7 = vector.broadcast %6 : vector<1x128xi1> to vector<8x128xi1>
    %8 = arith.select %7, %5, %2 : vector<8x128xi1>, vector<8x128xf32>
    %c1_i32 = arith.constant 1 : i32
    %9 = vector.broadcast %c1_i32 : i32 to vector<1x128xi32>
    %10 = arith.cmpi sge, %0, %9 : vector<1x128xi32>
    %c1_i32_5 = arith.constant 1 : i32
    %11 = tpu.dynamic_rotate %2 by %c1_i32_5 dim 1 : vector<8x128xf32>, i32 -> vector<8x128xf32>
    %12 = vector.shape_cast %10 : vector<1x128xi1> to vector<1x128xi1>
    %13 = vector.broadcast %12 : vector<1x128xi1> to vector<8x128xi1>
    %14 = arith.select %13, %11, %2 : vector<8x128xi1>, vector<8x128xf32>
    %c2_i32 = arith.constant 2 : i32
    %15 = vector.broadcast %c2_i32 : i32 to vector<1x128xi32>
    %16 = arith.cmpi sge, %0, %15 : vector<1x128xi32>
    %c2_i32_6 = arith.constant 2 : i32
    %17 = tpu.dynamic_rotate %2 by %c2_i32_6 dim 1 : vector<8x128xf32>, i32 -> vector<8x128xf32>
    %18 = vector.shape_cast %16 : vector<1x128xi1> to vector<1x128xi1>
    %19 = vector.broadcast %18 : vector<1x128xi1> to vector<8x128xi1>
    %20 = arith.select %19, %17, %14 : vector<8x128xi1>, vector<8x128xf32>
    %c3_i32 = arith.constant 3 : i32
    %21 = vector.broadcast %c3_i32 : i32 to vector<1x128xi32>
    %22 = arith.cmpi sge, %0, %21 : vector<1x128xi32>
    %c3_i32_7 = arith.constant 3 : i32
    %23 = tpu.dynamic_rotate %2 by %c3_i32_7 dim 1 : vector<8x128xf32>, i32 -> vector<8x128xf32>
    %24 = vector.shape_cast %22 : vector<1x128xi1> to vector<1x128xi1>
    %25 = vector.broadcast %24 : vector<1x128xi1> to vector<8x128xi1>
    %26 = arith.select %25, %23, %20 : vector<8x128xi1>, vector<8x128xf32>
    %27 = tpu.concatenate %26, %20, %14, %2, %8, %1 in 0 : vector<8x128xf32>, vector<8x128xf32>, vector<8x128xf32>, vector<8x128xf32>, vector<8x128xf32>, vector<8x128xf32> -> vector<48x128xf32>
    %c0_8 = arith.constant 0 : index
    %c0_9 = arith.constant 0 : index
    %28 = vector.load %arg4[%c0_8, %c0_9] : memref<16x48xf32, #tpu.memory_space<vmem>>, vector<16x48xf32>
    %cst = arith.constant dense<0.000000e+00> : vector<16x128xf32>
    %29 = tpu.matmul %28, %27, %cst {dimension_numbers = #tpu.dot_dimension_numbers<[1], [0], [0], [1], [0, 0, 1, 1], [], []>} : vector<16x48xf32>, vector<48x128xf32>, vector<16x128xf32> -> vector<16x128xf32>
    %cst_10 = arith.constant 0.000000e+00 : f32
    %30 = vector.broadcast %cst_10 : f32 to vector<16x128xf32>
    %31 = arith.cmpf ogt, %29, %30 : vector<16x128xf32>
    %cst_11 = arith.constant 0.00999999977 : f32
    %32 = vector.broadcast %cst_11 : f32 to vector<16x128xf32>
    %33 = arith.mulf %32, %29 : vector<16x128xf32>
    %34 = arith.select %31, %29, %33 : vector<16x128xi1>, vector<16x128xf32>
    %c127_i32_12 = arith.constant 127 : i32
    %35 = tpu.dynamic_rotate %34 by %c127_i32_12 dim 1 : vector<16x128xf32>, i32 -> vector<16x128xf32>
    %c126_i32 = arith.constant 126 : i32
    %36 = tpu.dynamic_rotate %34 by %c126_i32 dim 1 : vector<16x128xf32>, i32 -> vector<16x128xf32>
    %37 = tpu.concatenate %34, %35, %36, %1 in 0 : vector<16x128xf32>, vector<16x128xf32>, vector<16x128xf32>, vector<8x128xf32> -> vector<56x128xf32>
    %c0_13 = arith.constant 0 : index
    %c0_14 = arith.constant 0 : index
    %38 = vector.load %arg5[%c0_13, %c0_14] : memref<8x56xf32, #tpu.memory_space<vmem>>, vector<8x56xf32>
    %cst_15 = arith.constant dense<0.000000e+00> : vector<8x128xf32>
    %39 = tpu.matmul %38, %37, %cst_15 {dimension_numbers = #tpu.dot_dimension_numbers<[1], [0], [0], [1], [0, 0, 1, 1], [], []>} : vector<8x56xf32>, vector<56x128xf32>, vector<8x128xf32> -> vector<8x128xf32>
    %40 = math.tanh %39 : vector<8x128xf32>
    %c4_i32 = arith.constant 4 : i32
    %41 = tpu.dynamic_rotate %2 by %c4_i32 dim 0 : vector<8x128xf32>, i32 -> vector<8x128xf32>
    %42 = math.exp %40 : vector<8x128xf32>
    %43 = arith.mulf %41, %42 : vector<8x128xf32>
    %c7_i32 = arith.constant 7 : i32
    %44 = vector.broadcast %c7_i32 : i32 to vector<1x128xi32>
    %45 = arith.cmpi sle, %0, %44 : vector<1x128xi32>
    %c1_i32_16 = arith.constant 1 : i32
    %46 = tpu.dynamic_rotate %43 by %c1_i32_16 dim 1 : vector<8x128xf32>, i32 -> vector<8x128xf32>
    %47 = vector.shape_cast %45 : vector<1x128xi1> to vector<1x128xi1>
    %48 = vector.broadcast %47 : vector<1x128xi1> to vector<8x128xi1>
    %49 = arith.select %48, %43, %46 : vector<8x128xi1>, vector<8x128xf32>
    %c8_i32 = arith.constant 8 : i32
    %50 = vector.broadcast %c8_i32 : i32 to vector<1x128xi32>
    %51 = arith.cmpi sle, %0, %50 : vector<1x128xi32>
    %c1_i32_17 = arith.constant 1 : i32
    %52 = tpu.dynamic_rotate %49 by %c1_i32_17 dim 1 : vector<8x128xf32>, i32 -> vector<8x128xf32>
    %53 = vector.shape_cast %51 : vector<1x128xi1> to vector<1x128xi1>
    %54 = vector.broadcast %53 : vector<1x128xi1> to vector<8x128xi1>
    %55 = arith.select %54, %49, %52 : vector<8x128xi1>, vector<8x128xf32>
    %c6_i32_18 = arith.constant 6 : i32
    %56 = vector.broadcast %c6_i32_18 : i32 to vector<1x128xi32>
    %57 = arith.cmpi sle, %0, %56 : vector<1x128xi32>
    %c127_i32_19 = arith.constant 127 : i32
    %58 = tpu.dynamic_rotate %55 by %c127_i32_19 dim 1 : vector<8x128xf32>, i32 -> vector<8x128xf32>
    %59 = vector.shape_cast %57 : vector<1x128xi1> to vector<1x128xi1>
    %60 = vector.broadcast %59 : vector<1x128xi1> to vector<8x128xi1>
    %61 = arith.select %60, %58, %55 : vector<8x128xi1>, vector<8x128xf32>
    %c1_i32_20 = arith.constant 1 : i32
    %62 = vector.broadcast %c1_i32_20 : i32 to vector<1x128xi32>
    %63 = arith.cmpi sge, %0, %62 : vector<1x128xi32>
    %c1_i32_21 = arith.constant 1 : i32
    %64 = tpu.dynamic_rotate %55 by %c1_i32_21 dim 1 : vector<8x128xf32>, i32 -> vector<8x128xf32>
    %65 = vector.shape_cast %63 : vector<1x128xi1> to vector<1x128xi1>
    %66 = vector.broadcast %65 : vector<1x128xi1> to vector<8x128xi1>
    %67 = arith.select %66, %64, %55 : vector<8x128xi1>, vector<8x128xf32>
    %c2_i32_22 = arith.constant 2 : i32
    %68 = vector.broadcast %c2_i32_22 : i32 to vector<1x128xi32>
    %69 = arith.cmpi sge, %0, %68 : vector<1x128xi32>
    %c2_i32_23 = arith.constant 2 : i32
    %70 = tpu.dynamic_rotate %55 by %c2_i32_23 dim 1 : vector<8x128xf32>, i32 -> vector<8x128xf32>
    %71 = vector.shape_cast %69 : vector<1x128xi1> to vector<1x128xi1>
    %72 = vector.broadcast %71 : vector<1x128xi1> to vector<8x128xi1>
    %73 = arith.select %72, %70, %67 : vector<8x128xi1>, vector<8x128xf32>
    %c3_i32_24 = arith.constant 3 : i32
    %74 = vector.broadcast %c3_i32_24 : i32 to vector<1x128xi32>
    %75 = arith.cmpi sge, %0, %74 : vector<1x128xi32>
    %c3_i32_25 = arith.constant 3 : i32
    %76 = tpu.dynamic_rotate %55 by %c3_i32_25 dim 1 : vector<8x128xf32>, i32 -> vector<8x128xf32>
    %77 = vector.shape_cast %75 : vector<1x128xi1> to vector<1x128xi1>
    %78 = vector.broadcast %77 : vector<1x128xi1> to vector<8x128xi1>
    %79 = arith.select %78, %76, %73 : vector<8x128xi1>, vector<8x128xf32>
    %80 = tpu.concatenate %79, %73, %67, %55, %61, %1 in 0 : vector<8x128xf32>, vector<8x128xf32>, vector<8x128xf32>, vector<8x128xf32>, vector<8x128xf32>, vector<8x128xf32> -> vector<48x128xf32>
    %c0_26 = arith.constant 0 : index
    %c0_27 = arith.constant 0 : index
    %81 = vector.load %arg6[%c0_26, %c0_27] : memref<16x48xf32, #tpu.memory_space<vmem>>, vector<16x48xf32>
    %cst_28 = arith.constant dense<0.000000e+00> : vector<16x128xf32>
    %82 = tpu.matmul %81, %80, %cst_28 {dimension_numbers = #tpu.dot_dimension_numbers<[1], [0], [0], [1], [0, 0, 1, 1], [], []>} : vector<16x48xf32>, vector<48x128xf32>, vector<16x128xf32> -> vector<16x128xf32>
    %cst_29 = arith.constant 0.000000e+00 : f32
    %83 = vector.broadcast %cst_29 : f32 to vector<16x128xf32>
    %84 = arith.cmpf ogt, %82, %83 : vector<16x128xf32>
    %cst_30 = arith.constant 0.00999999977 : f32
    %85 = vector.broadcast %cst_30 : f32 to vector<16x128xf32>
    %86 = arith.mulf %85, %82 : vector<16x128xf32>
    %87 = arith.select %84, %82, %86 : vector<16x128xi1>, vector<16x128xf32>
    %c127_i32_31 = arith.constant 127 : i32
    %88 = tpu.dynamic_rotate %87 by %c127_i32_31 dim 1 : vector<16x128xf32>, i32 -> vector<16x128xf32>
    %c126_i32_32 = arith.constant 126 : i32
    %89 = tpu.dynamic_rotate %87 by %c126_i32_32 dim 1 : vector<16x128xf32>, i32 -> vector<16x128xf32>
    %90 = tpu.concatenate %87, %88, %89, %1 in 0 : vector<16x128xf32>, vector<16x128xf32>, vector<16x128xf32>, vector<8x128xf32> -> vector<56x128xf32>
    %c0_33 = arith.constant 0 : index
    %c0_34 = arith.constant 0 : index
    %91 = vector.load %arg7[%c0_33, %c0_34] : memref<8x56xf32, #tpu.memory_space<vmem>>, vector<8x56xf32>
    %cst_35 = arith.constant dense<0.000000e+00> : vector<8x128xf32>
    %92 = tpu.matmul %91, %90, %cst_35 {dimension_numbers = #tpu.dot_dimension_numbers<[1], [0], [0], [1], [0, 0, 1, 1], [], []>} : vector<8x56xf32>, vector<56x128xf32>, vector<8x128xf32> -> vector<8x128xf32>
    %93 = math.tanh %92 : vector<8x128xf32>
    %c4_i32_36 = arith.constant 4 : i32
    %94 = tpu.dynamic_rotate %43 by %c4_i32_36 dim 0 : vector<8x128xf32>, i32 -> vector<8x128xf32>
    %95 = arith.addf %94, %93 : vector<8x128xf32>
    %c0_37 = arith.constant 0 : index
    %c0_38 = arith.constant 0 : index
    %96 = vector.load %arg8[%c0_37, %c0_38] : memref<8x128xf32, #tpu.memory_space<vmem>>, vector<8x128xf32>
    tpu.vector_store %arg8[%c0_37, %c0_38], %95 {strides = array<i32>} : memref<8x128xf32, #tpu.memory_space<vmem>>, vector<8x128xf32>,
    return
  }
  func.func @transform_0(%arg0: i32) -> (i32, i32) {
    %c0_i32 = arith.constant 0 : i32
    %c0_i32_0 = arith.constant 0 : i32
    %c0_i32_1 = arith.constant 0 : i32
    return %c0_i32, %c0_i32_0 : i32, i32
  }
  func.func @transform_1(%arg0: i32) -> (i32, i32) {
    %c0_i32 = arith.constant 0 : i32
    %c0_i32_0 = arith.constant 0 : i32
    %c0_i32_1 = arith.constant 0 : i32
    return %c0_i32, %c0_i32_0 : i32, i32
  }
  func.func @transform_2(%arg0: i32) -> (i32, i32) {
    %c0_i32 = arith.constant 0 : i32
    %c0_i32_0 = arith.constant 0 : i32
    return %c0_i32, %arg0 : i32, i32
  }
  func.func @transform_3(%arg0: i32) -> (i32, i32) {
    %c0_i32 = arith.constant 0 : i32
    %c0_i32_0 = arith.constant 0 : i32
    %c0_i32_1 = arith.constant 0 : i32
    return %c0_i32, %c0_i32_0 : i32, i32
  }
  func.func @transform_4(%arg0: i32) -> (i32, i32) {
    %c0_i32 = arith.constant 0 : i32
    %c0_i32_0 = arith.constant 0 : i32
    %c0_i32_1 = arith.constant 0 : i32
    return %c0_i32, %c0_i32_0 : i32, i32
  }
  func.func @transform_5(%arg0: i32) -> (i32, i32) {
    %c0_i32 = arith.constant 0 : i32
    %c0_i32_0 = arith.constant 0 : i32
    %c0_i32_1 = arith.constant 0 : i32
    return %c0_i32, %c0_i32_0 : i32, i32
  }
  func.func @transform_6(%arg0: i32) -> (i32, i32) {
    %c0_i32 = arith.constant 0 : i32
    %c0_i32_0 = arith.constant 0 : i32
    %c0_i32_1 = arith.constant 0 : i32
    return %c0_i32, %c0_i32_0 : i32, i32
  }
  func.func @transform_7(%arg0: i32) -> (i32, i32) {
    %c0_i32 = arith.constant 0 : i32
    %c0_i32_0 = arith.constant 0 : i32
    return %c0_i32, %arg0 : i32, i32
  }
}

</mosaic_0001>

<bundles_post_ra>
// kernel: tpu_custom_call.1
= control target key start
LH: loop header
LB: loop body
LE: loop exit
PB: predicated region body
PF: predicated region fallthrough
CT: control target
= control target key end

     0   :  { %s1787_s0 = inlined_call_operand.hbm [shape: s32[1,128], index: 0, kind: input, shape index: {}]   ;;  %s1788_s1 = inlined_call_operand.hbm [shape: f32[8,128], index: 1, kind: input, shape index: {}]   ;;  %s1789_s2 = inlined_call_operand.hbm [shape: f32[8,256], index: 2, kind: input, shape index: {}]   ;;  %s1790_s3 = inlined_call_operand.hbm [shape: f32[16,48], index: 3, kind: input, shape index: {}]   ;;  %s1791_s4 = inlined_call_operand.hbm [shape: f32[8,56], index: 4, kind: input, shape index: {}]   ;;  %s1792_s5 = inlined_call_operand.hbm [shape: f32[16,48], index: 5, kind: input, shape index: {}]   ;;  %s1793_s6 = inlined_call_operand.vmem [shape: f32[8,56], index: 6, kind: input, shape index: {}]   ;;  %s1794_s7 = inlined_call_operand.hbm [shape: f32[8,256], index: 7, kind: output, shape index: {}]  }
   0x1   :  { %1799 = sst [smem:[#allocation19_spill]] %s1787_s0 }
   0x2   :  { %1800 = sst [smem:[#allocation20_spill]] %s1788_s1 }
   0x3   :  { %12 = vsyncpa [#allocation3], 0 }
   0x4   :  { %13 = vsyncpa [#allocation6], 0 }
   0x5   :  { %14 = vsyncpa [#allocation10], 0 }
   0x6   :  { %15 = vsyncpa [#allocation4], 0 }
   0x7   :  { %17 = vsyncpa [#allocation4 + $0x1], 0  ;;  %s1451_s24 = smov 0   ;;  %s1453_s25 = smov 0  }
   0x8   :  { %s1455_s26 = smov 0   ;;  %s1457_s27 = smov 0  }
   0x9 LB: > { %s1394_s28 = smov [#allocation2]   ;;  %s1472_s30 = sadd.s32 4294967295, %s1392_s27   ;;  %s1392_s27 = sphi %s1457_s27, %s1835_s27   ;;  %s1388_s26 = sphi %s1455_s26, %s1834_s26   ;;  %s1384_s25 = sphi %s1453_s25, %s1833_s25   ;;  %s1380_s24 = sphi %s1451_s24, %s1832_s24  }
   0xa   : > { %s219_s29 = sshll.u32 %s1394_s28, 4  ;;  %p918_p0 = scmp.ge.s32.totalorder %s1392_s27, 1  ;;  %s220_s29 = int_to_ptr.vmem [resolvable:$true] %s219_s29 }
   0xb   : > { %p1795_p1 = scmp.eq.s32.totalorder %s1472_s30, 0  ;;  %p206_p2 = scmp.lt.s32.totalorder %s1392_s27, 3 }
   0xc   : > { %s1395_s9 = smov [#allocation5]   ;;  %s1396_s11 = smov [#allocation9]  }
   0xd   : > { %p1477_p3 = pnand %p918_p0, %p206_p2  ;;  %s230_s10 = sshll.u32 %s1395_s9, 4  ;;  %s231_s10 = int_to_ptr.vmem [resolvable:$true] %s230_s10 }
   0xe   : > { %s254_s12 = sshll.u32 %s1396_s11, 4  ;;  %s1397_s14 = smov [#allocation8]   ;;  %s1490_s12 = int_to_ptr.vmem [resolvable:$true] %s254_s12 }
   0xf   : > { %s1801_s8 = scalar_select %p1477_p3, 1, 0 }
  0x10   : > { %p1065_p5 = pneg %p1477_p3  ;;  %s1492_s15 = sshll.u32 %s1397_s14, 4  ;;  %s241_s15 = int_to_ptr.vmem [resolvable:$true] %s1492_s15 }
  0x11   : > { %s1165_s17 = scalar_lea.vmem %s220_s29, 16  ;;  %s1172_s18 = scalar_lea.vmem %s220_s29, 32 }
  0x12   : > { %p1486_p6 = pnand %p1065_p5, %p1795_p1  ;;  %p1166_p8 = scmp.ne.s32.totalorder %s220_s29, %s1165_s17 }
  0x13   : > { %p1173_p11 = scmp.lt.s32.totalorder %s220_s29, %s220_s29  ;;  %p1174_p12 = scmp.lt.s32.totalorder %s1172_s18, %s1165_s17 }
  0x14   : > { %p1496_p7 = pneg %p1486_p6 }
  0x15   : > { %p1175_p13 = por %p1174_p12, %p1173_p11 }
  0x16   : > { %p1168_p9 = pnand %p1166_p8, %p1496_p7 }
  0x18   : > { %p1169_p10 = pneg %p1168_p9 }
  0x1a   : > { %p1176_p0 = pnand %p1175_p13, %p1169_p10 }
  0x1c   : > { %1179 = shalt.err (!%p1176_p0)
}
  0x1d   : > { %s1804_s0 = sld [smem:[#allocation19_spill]]  ;;  %s1191_s21 = scalar_lea.vmem %s231_s10, 128 }
  0x1e   : > { %p1192_p2 = scmp.ne.s32.totalorder %s231_s10, %s1191_s21  ;;  %p1199_p8 = scmp.lt.s32.totalorder %s231_s10, %s231_s10 }
  0x1f   : > { %p1200_p9 = scmp.lt.s32.totalorder %s1191_s21, %s1191_s21 }
  0x20   : > { %p1194_p5 = pnand %p1192_p2, %p1496_p7 }
  0x21   : > { %p1201_p1 = por %p1200_p9, %p1199_p8 }
  0x22   : > { %p1195_p4 = pneg %p1194_p5 }
  0x23   : > { %1068 = dma.hbm_to_vmem [thread:$0]  (!%p1486_p6), %s1804_s0, 16, %s220_s29, [#allocation3]  }
  0x24   : > { %p1202_p3 = pnand %p1201_p1, %p1195_p4 }
  0x26   : > { %1205 = shalt.err (!%p1202_p3)
}
  0x27   : > { %s1805_s1 = sld [smem:[#allocation20_spill]]  ;;  %s1217_s28 = scalar_lea.vmem %s1490_s12, 128 }
  0x28   : > { %p1218_p10 = scmp.ne.s32.totalorder %s1490_s12, %s1217_s28  ;;  %p1225_p13 = scmp.lt.s32.totalorder %s1490_s12, %s1490_s12 }
  0x29   : > { %p1226_p0 = scmp.lt.s32.totalorder %s1217_s28, %s1217_s28 }
  0x2a   : > { %p1220_p11 = pnand %p1218_p10, %p1496_p7 }
  0x2b   : > { %p1227_p1 = por %p1226_p0, %p1225_p13 }
  0x2c   : > { %p1221_p12 = pneg %p1220_p11 }
  0x2d   : > { %1071 = dma.hbm_to_vmem [thread:$0]  (!%p1486_p6), %s1805_s1, 128, %s231_s10, [#allocation6]  }
  0x2e   : > { %p1228_p3 = pnand %p1227_p1, %p1221_p12 }
  0x30   : > { %1231 = shalt.err (!%p1228_p3)
}
  0x31   : > { %1077 = dma.hbm_to_vmem [thread:$0]  (!%p1486_p6), %s1791_s4, 128, %s1490_s12, [#allocation10]  }
  0x32   : > { %s1243_s10 = scalar_lea.vmem %s241_s15, 256  ;;  %p1251_p8 = scmp.lt.s32.totalorder %s241_s15, %s241_s15 }
  0x33   : > { %p1244_p4 = scmp.ne.s32.totalorder %s241_s15, %s1243_s10  ;;  %p1252_p9 = scmp.lt.s32.totalorder %s1243_s10, %s1243_s10 }
  0x35   : > { %p1246_p2 = pnand %p1244_p4, %p1496_p7  ;;  %p1253_p10 = por %p1252_p9, %p1251_p8 }
  0x37   : > { %p1247_p5 = pneg %p1246_p2 }
  0x39   : > { %p1254_p11 = pnand %p1253_p10, %p1247_p5 }
  0x3b   : > { %1257 = shalt.err (!%p1254_p11)
}
  0x3c   : > { %s1398_s11 = smov 128   ;;  %s1399_s14 = smov 8  }
  0x3d   : > { %1074 = dma.hbm_to_vmem [thread:$0]  (!%p1486_p6), %s1790_s3, 256, %s241_s15, [#allocation6], %s1398_s11, %s1398_s11, %s1399_s14  }
  0x3e   : > { %s1400_s12 = smov [#allocation11]  }
  0x3f   : > { %s264_s19 = sshll.u32 %s1400_s12, 4  ;;  %s265_s19 = int_to_ptr.vmem [resolvable:$true] %s264_s19 }
  0x40   : > { %s1269_s20 = scalar_lea.vmem %s265_s19, 256  ;;  %p1277_p1 = scmp.lt.s32.totalorder %s265_s19, %s265_s19 }
  0x41   : > { %p1270_p12 = scmp.ne.s32.totalorder %s265_s19, %s1269_s20  ;;  %p1278_p3 = scmp.lt.s32.totalorder %s1269_s20, %s1269_s20 }
  0x43   : > { %p1272_p13 = pnand %p1270_p12, %p1496_p7  ;;  %p1279_p4 = por %p1278_p3, %p1277_p1 }
  0x45   : > { %p1273_p0 = pneg %p1272_p13 }
  0x47   : > { %p1280_p2 = pnand %p1279_p4, %p1273_p0 }
  0x49   : > { %1283 = shalt.err (!%p1280_p2)
}
  0x4a   : > { %1080 = dma.hbm_to_vmem [thread:$0]  (!%p1486_p6), %s1792_s5, 256, %s265_s19, [#allocation10], %s1398_s11, %s1398_s11, %s1399_s14  }
  0x4b   : > { %s917_s15 = sadd.s32 4294967294, %s1392_s27   ;;  %s1543_s13 = sadd.s32 1, %s1392_s27  }
  0x4c   : > { %s72_s16 = sadd.s32 1, %s1388_s26  ;;  %s69_s23 = ssub.s32 %s1392_s27, %s1543_s13 }
  0x4d   : > { %p79_p7 = scmp.ne.s32.totalorder %s1388_s26, %s1384_s25  ;;  %p70_p5 = scmp.eq.s32.totalorder %s69_s23, 0 }
  0x4e   : > { %p80_p8 = scmp.eq.s32.totalorder %s1392_s27, 0  ;;  %p85_p9 = scmp.ne.s32.totalorder %s1384_s25, %s1380_s24 }
  0x4f   : > { %p193_p10 = scmp.eq.s32.totalorder %s1472_s30, 1  ;;  %p1806_p12 = scmp.eq.s32.totalorder %s1472_s30, 0 }
  0x50   : > { %s1555_s28 = scalar_select %p70_p5, %s1388_s26, %s72_s16  }
  0x51   : > { %p81_p11 = por %p80_p8, %p79_p7  ;;  %p1559_p13 = por %p1806_p12, %p85_p9 }
  0x52   : > { %p1563_p6 = por %p193_p10, %p79_p7  ;;  %p199_p0 = scmp.eq.s32.totalorder %s917_s15, 1 }
  0x53   : > { %s1807_s29 = scalar_select %p1559_p13, 1, 0 }
  0x54   : > { %s1808_s9 = scalar_select %p1563_p6, 1, 0 }
  0x55   : > { %p1094_p1 = scmp.lt.s32.totalorder %s1392_s27, 2  ;;  %s281_s10 = sand.u32 1, %s1392_s27  }
  0x56   : > { %p1569_p3 = por %p199_p0, %p85_p9  ;;  %s283_s14 = sand.u32 1, %s1388_s26  }
  0x57   : > { %s926_s17 = sshll.u32 %s1392_s27, 7  ;;  %s925_s18 = sshll.u32 %s283_s14, 3 }
  0x58   : > { %s1809_s11 = scalar_select %p1569_p3, 1, 0 }
  0x59   : > { %s1578_s20 = scalar_lea.hbm %s1789_s2, %s926_s17  ;;  %p1580_p4 = pnand %p1094_p1, %p81_p11 }
  0x5a   : > { %s285_s22 = scalar_lea.vmem [#allocation7], %s925_s18  ;;  %s282_s16 = scalar_lea.sflag [#allocation3], %s281_s10 }
  0x5b   : > { %s292_s15 = sshll.u32 %s285_s22, 4  ;;  %s1284_s23 = scalar_lea.hbm %s1578_s20, 128  ;;  %s293_s15 = int_to_ptr.vmem [resolvable:$true] %s292_s15 }
  0x5c   : > { %p1285_p2 = scmp.ne.s32.totalorder %s1578_s20, %s1284_s23  ;;  %p1286_p7 = pneg %p1580_p4 }
  0x5d   : > { %s1289_s12 = scalar_lea.hbm %s1789_s2, 256  ;;  %p1290_p9 = scmp.lt.s32.totalorder %s1578_s20, %s1789_s2 }
  0x5e   : > { %p1287_p5 = pnand %p1286_p7, %p1285_p2  ;;  %p1291_p10 = scmp.lt.s32.totalorder %s1289_s12, %s1284_s23 }
  0x60   : > { %p1288_p8 = pneg %p1287_p5  ;;  %p1292_p11 = por %p1291_p10, %p1290_p9 }
  0x62   : > { %p1293_p12 = pnand %p1292_p11, %p1288_p8 }
  0x64   : > { %1296 = shalt.err (!%p1293_p12)
}
  0x65   : > { %s1297_s18 = scalar_lea.vmem %s293_s15, 128  ;;  %s1401_s10 = smov [#allocation7]  }
  0x66   : > { %p1298_p0 = scmp.ne.s32.totalorder %s293_s15, %s1297_s18  ;;  %s1302_s22 = sshll.u32 %s1401_s10, 4  ;;  %s1303_s22 = int_to_ptr.vmem [resolvable:$false] %s1302_s22 }
  0x67   : > { %s1304_s1 = scalar_lea.vmem %s1303_s22, 256  ;;  %p1305_p2 = scmp.lt.s32.totalorder %s293_s15, %s1303_s22 }
  0x68   : > { %p1300_p1 = pnand %p1298_p0, %p1286_p7  ;;  %p1306_p5 = scmp.lt.s32.totalorder %s1304_s1, %s1297_s18 }
  0x6a   : > { %p1301_p3 = pneg %p1300_p1  ;;  %p1307_p6 = por %p1306_p5, %p1305_p2 }
  0x6c   : > { %p1308_p13 = pnand %p1307_p6, %p1301_p3 }
  0x6e   : > { %1311 = shalt.err (!%p1308_p13)
}
  0x6f   : > { %1084 = dma.hbm_to_vmem [thread:$0]  (!%p1580_p4), %s1578_s20, 128, %s293_s15, %s282_s16  }
  0x70   : > { %p1811_p8 = scmp.ne.s32.totalorder %s1801_s8, 0 }
  0x71   : > { %p1812_p9 = scmp.eq.s32.totalorder (!%p1811_p8), %s1472_s30, 0 }
  0x72   : > { %301 = sbr.rel (%p1811_p8) target bundleno = 1712 (0x6b0), region = 48 }
  0x77   : > { %1355 = dma.done.wait (%p1812_p9), [#allocation3], 16   ;;  %p1813_p7 = pmov %p1812_p9 }
  0x79   : > { %1357 = vsyncadd (%p1813_p7), [#allocation3], 4294967280  ;;  %p1814_p10 = pmov %p1813_p7 }
  0x7a   : > { %p1815_p11 = pmov %p1813_p7 }
  0x7b   : > { %1359 = dma.done.wait (%p1814_p10), [#allocation6], 128  }
  0x7c   : > { %1361 = vsyncadd (%p1815_p11), [#allocation6], 4294967168  ;;  %s311_s0 = sand.u32 1, %s1472_s30   ;;  %s313_s1 = sand.u32 1, %s1384_s25  }
  0x7d   : > { %s1612_s8 = sshll.u32 %s313_s1, 3  ;;  %s312_s20 = scalar_lea.sflag [#allocation3], %s311_s0 }
  0x7e   : > { %s315_s21 = scalar_lea.vmem [#allocation7], %s1612_s8  ;;  %p1816_p13 = scmp.ne.s32.totalorder %s1807_s29, 0 }
  0x80   : > { %1363 = dma.done.wait (%p1816_p13), %s312_s20, 128  }
  0x81   : > { %1365 = vsyncadd (%p1816_p13), %s312_s20, 4294967168  ;;  %p1817_p6 = pmov %p1813_p7 }
  0x83   : > { %1367 = dma.done.wait (%p1817_p6), [#allocation6], 256   ;;  %p1818_p3 = pmov %p1817_p6 }
  0x85   : > { %1369 = vsyncadd (%p1818_p3), [#allocation6], 4294967040  ;;  %p1819_p4 = pmov %p1818_p3 }
  0x86   : > { %p1820_p12 = pmov %p1818_p3 }
  0x87   : > { %1371 = dma.done.wait (%p1819_p4), [#allocation10], 384  }
  0x88   : > { %1373 = vsyncadd (%p1820_p12), [#allocation10], 4294966912  ;;  %vm403_vm0 = vcmask 392192   ;;  %v1627_v0 = vld [vmem:[%s315_s21] sm:$0xff]  ;;  %v1629_v1 = vld [vmem:[#allocation5] sm:$0xff]  ;;  %s1402_s15 = smov 127   ;;  %v365_v3 = vlaneseq }
  0x89   : > { %362 = vrot.lane.b32.xlu0 %v1627_v0, %s1402_s15  ;;  %s1403_s29 = smov 2   ;;  %v401_v2 = vld [vmem:[#allocation8] sm:$0xff]  ;;  %977 = vmatprep.subr.mxu0 %v1629_v1  ;;  %s1404_s16 = smov 1   ;;  %v1406_v7 = vmov 0   ;;  %v402_v28 = vld [vmem:[#allocation8 + $0x8] sm:$0xff]  ;;  %v1407_v29 = vmov 0.0  }
  0x8a   : > { %382 = vrot.lane.b32.xlu1 %v1627_v0, %s1403_s29  ;;  %989 = vmatprep.mubr.msk.f32.mxu0 %vm403_vm0, %v401_v2  ;;  %s1405_s23 = smov 3   ;;  %v1642_v4 = vld [vmem:[#allocation2] sm:$0x1]  ;;  %v366_v5 = vshrl.u32 %v365_v3, 7  ;;  %vm1408_vm10 = vmmov 0   ;;  %s1409_s14 = smov 126  }
  0x8b   : > { %978 = vmatpush3.msra.mxu0 %v1629_v1  ;;  %vm361_vm1 = vcmp.le.s32.totalorder %v1642_v4, 6  ;;  %vm371_vm2 = vcmp.ge.s32.totalorder %v1642_v4, 1  ;;  %vm381_vm3 = vcmp.ge.s32.totalorder %v1642_v4, 2  ;;  %vm391_vm4 = vcmp.ge.s32.totalorder %v1642_v4, 3  ;;  %992 = vmatprep.subr.mxu1 %v1407_v29  ;;  %v499_v40 = vld [vmem:[#allocation9] sm:$0xff]  ;;  %v611_v54 = vld [vmem:[#allocation11] sm:$0xff] }
  0x8c   : > { %v1645_v6 = vsub.s32 0, %v366_v5  ;;  %v364_v8 = vsel %vm361_vm1, 1, %v1406_v7  ;;  %v374_v10 = vsel %vm371_vm2, 1, %v1406_v7  ;;  %v384_v11 = vsel %vm381_vm3, 1, %v1406_v7  ;;  %993 = vmatpush3.msra.mxu1 %v1629_v1  ;;  %1006 = vmatprep.mubr.msk.f32.mxu1 %vm1408_vm10, %v1407_v29  ;;  %v708_v12 = vld [vmem:[%s1793_s6] sm:$0xff]  ;;  %s942_s19 = sshll.u32 %s1472_s30, 7 }
  0x8d   : > { %372 = vrot.lane.b32.xlu0 %v1627_v0, %s1404_s16  ;;  %v394_v15 = vsel %vm391_vm4, 1, %v1406_v7  ;;  %994 = vmatprep.subr.mxu1 %v1407_v29  ;;  %vm500_vm12 = vcmask 457728   ;;  %v575_v45 = vrot.slane %v1627_v0, 4  ;;  %vm579_vm13 = vcmp.le.s32.totalorder %v1642_v4, 7  ;;  %s357_s18 = scalar_lea.vmem [#allocation12], %s1612_s8  ;;  %s798_s20 = scalar_lea.hbm %s1794_s7, %s942_s19 }
  0x8e   : > { %392 = vrot.lane.b32.xlu1 %v1627_v0, %s1405_s23  ;;  %v368_v9 = vrot.slane %v364_v8, %v1645_v6  ;;  %v378_v13 = vrot.slane %v374_v10, %v1645_v6  ;;  %v388_v14 = vrot.slane %v384_v11, %v1645_v6  ;;  %v398_v20 = vrot.slane %v394_v15, %v1645_v6  ;;  %s800_s10 = sshll.u32 %s357_s18, 4  ;;  %s787_s21 = scalar_lea.sflag [#allocation4], %s313_s1  ;;  %s801_s10 = int_to_ptr.vmem [resolvable:$true] %s800_s10 }
  0x8f   : > { %v582_v48 = vsel %vm579_vm13, 1, %v1406_v7  ;;  %vm589_vm15 = vcmp.le.s32.totalorder %v1642_v4, 8  ;;  %p1829_p1 = scmp.ne.s32.totalorder %s1808_s9, 0  ;;  %s1410_s30 = smov [#allocation12]  }
  0x90   : > { %vm1654_vm5 = vcmp.eq.s32.totalorder %v368_v9, 1  ;;  %vm1664_vm6 = vcmp.eq.s32.totalorder %v378_v13, 1  ;;  %vm1669_vm7 = vcmp.eq.s32.totalorder %v388_v14, 1  ;;  %vm1680_vm8 = vcmp.eq.s32.totalorder %v398_v20, 1  ;;  %s1316_s8 = sshll.u32 %s1410_s30, 4  ;;  %s1317_s8 = int_to_ptr.vmem [resolvable:$false] %s1316_s8 }
  0x91   : > { %v586_v49 = vrot.slane %v582_v48, %v1645_v6  ;;  %v592_v52 = vsel %vm589_vm15, 1, %v1406_v7  ;;  %p1319_p8 = scmp.lt.s32.totalorder %s801_s10, %s1317_s8 }
  0x92   : > { %v596_v53 = vrot.slane %v592_v52, %v1645_v6 }
  0x93   : > { %vm587_vm14 = vcmp.eq.s32.totalorder %v586_v49, 1 }
  0x94   : > { %vm597_vm1 = vcmp.eq.s32.totalorder %v596_v53, 1 }
  0xfb   : > { %v363_v16 = vpop.permute.xlu0 %362 }
  0xfc   : > { %v383_v17 = vpop.permute.xlu1 %382  ;;  %v370_v18 = vsel %vm1654_vm5, %v363_v16, %v1627_v0 }
  0xfd   : > { %979 = vmatprep.subr.mxu0 %v370_v18 }
  0xfe   : > { %980 = vmatpush3.msra.mxu0 %v370_v18 }
  0xff   : > { %v373_v22 = vpop.permute.xlu0 %372  ;;  %981 = vmatprep.subr.mxu0 %v1627_v0 }
 0x100   : > { %982 = vmatpush3.msra.mxu0 %v1627_v0  ;;  %v380_v23 = vsel %vm1664_vm6, %v373_v22, %v1627_v0  ;;  %v393_v24 = vpop.permute.xlu1 %392 }
 0x101   : > { %983 = vmatprep.subr.mxu0 %v380_v23  ;;  %v390_v25 = vsel %vm1669_vm7, %v383_v17, %v380_v23 }
 0x102   : > { %984 = vmatpush3.msra.mxu0 %v380_v23  ;;  %v400_v27 = vsel %vm1680_vm8, %v393_v24, %v390_v25 }
 0x103   : > { %985 = vmatprep.subr.mxu0 %v390_v25 }
 0x104   : > { %986 = vmatpush3.msra.mxu0 %v390_v25 }
 0x105   : > { %987 = vmatprep.subr.mxu0 %v400_v27 }
 0x106   : > { %988 = vmatpush3.msra.mxu0 %v400_v27 }
 0x107   : > { %990 = vmatmul.mubr.msk.f32.vlgmr.msra.gmra.mxu0 %vm403_vm0, %v402_v28  ;;  %1009 = vmatprep.subr.mxu0 %v1629_v1 }
 0x108   : > { %1010 = vmatpush3.msra.mxu0 %v1629_v1  ;;  %1021 = vmatprep.mubr.msk.f32.mxu0 %vm403_vm0, %v611_v54 }
 0x1c7   : > { %v991_v30 = vpop.f32.mrf.mxu0 }
 0x1c8   : > { %vm486_vm9 = vcmp.gt.f32.partialorder %v991_v30, 0.0  ;;  %v488_v31 = vmul.f32 0.01, %v991_v30 }
 0x1c9   : > { %v476_v32 = vpop.f32.mrf.mxu0 }
 0x1ca   : > { %vm485_vm11 = vcmp.gt.f32.partialorder %v476_v32, 0.0  ;;  %v487_v33 = vmul.f32 0.01, %v476_v32  ;;  %v490_v34 = vsel %vm486_vm9, %v991_v30, %v488_v31 }
 0x1cb   : > { %497 = vrot.lane.b32.xlu0 %v490_v34, %s1409_s14 }
 0x1cc   : > { %v489_v35 = vsel %vm485_vm11, %v476_v32, %v487_v33 }
 0x1cd   : > { %495 = vrot.lane.b32.xlu1 %v489_v35, %s1409_s14 }
 0x1cf   : > { %493 = vrot.lane.b32.xlu0 %v490_v34, %s1402_s15 }
 0x1d1   : > { %491 = vrot.lane.b32.xlu1 %v489_v35, %s1402_s15 }
 0x23d   : > { %v498_v36 = vpop.permute.xlu0 %497 }
 0x23e   : > { %995 = vmatpush3.msra.mxu1 %v498_v36 }
 0x23f   : > { %996 = vmatprep.subr.mxu1 %v1407_v29  ;;  %v496_v37 = vpop.permute.xlu1 %495 }
 0x240   : > { %997 = vmatpush3.msra.mxu1 %v496_v37 }
 0x241   : > { %v494_v38 = vpop.permute.xlu0 %493  ;;  %998 = vmatprep.subr.mxu1 %v1407_v29 }
 0x242   : > { %999 = vmatpush3.msra.mxu1 %v494_v38 }
 0x243   : > { %1000 = vmatprep.subr.mxu1 %v1407_v29  ;;  %v492_v39 = vpop.permute.xlu1 %491 }
 0x244   : > { %1001 = vmatpush3.msra.mxu1 %v492_v39 }
 0x245   : > { %1002 = vmatprep.subr.mxu1 %v1407_v29 }
 0x246   : > { %1003 = vmatpush3.msra.mxu1 %v490_v34 }
 0x247   : > { %1004 = vmatprep.subr.mxu1 %v1407_v29 }
 0x248   : > { %1005 = vmatpush3.msra.mxu1 %v489_v35 }
 0x249   : > { %1007 = vmatmul.mubr.msk.f32.vlgmr.msra.gmra.mxu1 %vm500_vm12, %v499_v40  ;;  %1024 = vmatprep.subr.mxu1 %v1407_v29 }
 0x24a   : > { %1025 = vmatpush3.msra.mxu1 %v1629_v1  ;;  %1038 = vmatprep.mubr.msk.f32.mxu1 %vm1408_vm10, %v1407_v29  ;;  %v612_v1 = vld [vmem:[#allocation11 + $0x8] sm:$0xff] }
 0x24b   : > { %1026 = vmatprep.subr.mxu1 %v1407_v29 }
 0x309   : > { %v570_v41 = vpop.f32.mrf.mxu1 }
 0x30a   : > { %1148 = vtanh.f32 %v570_v41 }
 0x30b   : > { %v1008_v42 = vpop.f32.mrf.mxu1 }
 0x317   : > { %v1149_v43 = vpop.eup %1148 }
 0x318   : > { %v576_v44 = vmul.f32 1.442695, %v1149_v43 }
 0x31a   : > { %1150 = vpow2.f32 %v576_v44 }
 0x327   : > { %v1151_v46 = vpop.eup %1150 }
 0x328   : > { %v1710_v47 = vmul.f32 %v1151_v46, %v575_v45 }
 0x32a   : > { %580 = vrot.lane.b32.xlu0 %v1710_v47, %s1404_s16  ;;  %v783_v15 = vrot.slane %v1710_v47, 4 }
 0x39c   : > { %v581_v50 = vpop.permute.xlu0 %580 }
 0x39d   : > { %v588_v51 = vsel %vm587_vm14, %v1710_v47, %v581_v50 }
 0x39e   : > { %590 = vrot.lane.b32.xlu1 %v588_v51, %s1404_s16 }
 0x410   : > { %v591_v55 = vpop.permute.xlu1 %590 }
 0x411   : > { %v598_v56 = vsel %vm597_vm1, %v588_v51, %v591_v55 }
 0x412   : > { %602 = vrot.lane.b32.xlu1 %v598_v56, %s1404_s16  ;;  %599 = vrot.lane.b32.xlu0 %v598_v56, %s1402_s15 }
 0x416   : > { %608 = vrot.lane.b32.xlu1 %v598_v56, %s1405_s23  ;;  %605 = vrot.lane.b32.xlu0 %v598_v56, %s1403_s29  ;;  %s1318_s29 = scalar_lea.vmem %s1317_s8, 256 }
 0x484   : > { %v603_v57 = vpop.permute.xlu1 %602  ;;  %v600_v58 = vpop.permute.xlu0 %599 }
 0x485   : > { %v601_v59 = vsel %vm1654_vm5, %v600_v58, %v598_v56  ;;  %v604_v61 = vsel %vm1664_vm6, %v603_v57, %v598_v56 }
 0x486   : > { %1011 = vmatprep.subr.mxu0 %v601_v59 }
 0x487   : > { %1012 = vmatpush3.msra.mxu0 %v601_v59 }
 0x488   : > { %1013 = vmatprep.subr.mxu0 %v598_v56  ;;  %v606_v60 = vpop.permute.xlu0 %605  ;;  %v609_v62 = vpop.permute.xlu1 %608 }
 0x489   : > { %1014 = vmatpush3.msra.mxu0 %v598_v56  ;;  %v607_v63 = vsel %vm1669_vm7, %v606_v60, %v604_v61 }
 0x48a   : > { %1015 = vmatprep.subr.mxu0 %v604_v61  ;;  %v610_v0 = vsel %vm1680_vm8, %v609_v62, %v607_v63 }
 0x48b   : > { %1016 = vmatpush3.msra.mxu0 %v604_v61 }
 0x48c   : > { %1017 = vmatprep.subr.mxu0 %v607_v63 }
 0x48d   : > { %1018 = vmatpush3.msra.mxu0 %v607_v63 }
 0x48e   : > { %1019 = vmatprep.subr.mxu0 %v610_v0 }
 0x48f   : > { %1020 = vmatpush3.msra.mxu0 %v610_v0 }
 0x490   : > { %1022 = vmatmul.mubr.msk.f32.vlgmr.msra.gmra.mxu0 %vm403_vm0, %v612_v1 }
 0x550   : > { %v1023_v2 = vpop.f32.mrf.mxu0 }
 0x551   : > { %vm695_vm2 = vcmp.gt.f32.partialorder %v1023_v2, 0.0  ;;  %v697_v3 = vmul.f32 0.01, %v1023_v2 }
 0x552   : > { %v685_v4 = vpop.f32.mrf.mxu0 }
 0x553   : > { %vm694_vm3 = vcmp.gt.f32.partialorder %v685_v4, 0.0  ;;  %v696_v5 = vmul.f32 0.01, %v685_v4  ;;  %v699_v6 = vsel %vm695_vm2, %v1023_v2, %v697_v3 }
 0x554   : > { %706 = vrot.lane.b32.xlu0 %v699_v6, %s1409_s14 }
 0x555   : > { %v698_v7 = vsel %vm694_vm3, %v685_v4, %v696_v5 }
 0x556   : > { %704 = vrot.lane.b32.xlu1 %v698_v7, %s1409_s14 }
 0x558   : > { %702 = vrot.lane.b32.xlu0 %v699_v6, %s1402_s15 }
 0x55a   : > { %700 = vrot.lane.b32.xlu1 %v698_v7, %s1402_s15  ;;  %s1312_s15 = scalar_lea.vmem %s801_s10, 128 }
 0x55b   : > { %p1313_p0 = scmp.ne.s32.totalorder %s801_s10, %s1312_s15  ;;  %p1320_p9 = scmp.lt.s32.totalorder %s1318_s29, %s1312_s15 }
 0x55d   : > { %p1314_p2 = pnand %p1313_p0, %p1829_p1  ;;  %p1321_p7 = por %p1320_p9, %p1319_p8 }
 0x55f   : > { %p1315_p5 = pneg %p1314_p2 }
 0x561   : > { %p1322_p10 = pnand %p1321_p7, %p1315_p5 }
 0x5c6   : > { %v707_v8 = vpop.permute.xlu0 %706 }
 0x5c7   : > { %1027 = vmatpush3.msra.mxu1 %v707_v8 }
 0x5c8   : > { %1028 = vmatprep.subr.mxu1 %v1407_v29  ;;  %v705_v9 = vpop.permute.xlu1 %704 }
 0x5c9   : > { %1029 = vmatpush3.msra.mxu1 %v705_v9 }
 0x5ca   : > { %v703_v10 = vpop.permute.xlu0 %702  ;;  %1030 = vmatprep.subr.mxu1 %v1407_v29 }
 0x5cb   : > { %1031 = vmatpush3.msra.mxu1 %v703_v10 }
 0x5cc   : > { %1032 = vmatprep.subr.mxu1 %v1407_v29  ;;  %v701_v11 = vpop.permute.xlu1 %700 }
 0x5cd   : > { %1033 = vmatpush3.msra.mxu1 %v701_v11 }
 0x5ce   : > { %1034 = vmatprep.subr.mxu1 %v1407_v29 }
 0x5cf   : > { %1035 = vmatpush3.msra.mxu1 %v699_v6 }
 0x5d0   : > { %1036 = vmatprep.subr.mxu1 %v1407_v29 }
 0x5d1   : > { %1037 = vmatpush3.msra.mxu1 %v698_v7 }
 0x5d2   : > { %1039 = vmatmul.mubr.msk.f32.vlgmr.msra.gmra.mxu1 %vm500_vm12, %v708_v12 }
 0x692   : > { %v778_v13 = vpop.f32.mrf.mxu1 }
 0x693   : > { %1152 = vtanh.f32 %v778_v13 }
 0x694   : > { %v1040_v14 = vpop.f32.mrf.mxu1 }
 0x6a0   : > { %v1153_v16 = vpop.eup %1152 }
 0x6a1   : > { %v784_v17 = vadd.f32 %v1153_v16, %v783_v15 }
 0x6a3   : > { %785 = vst [vmem:[%s357_s18] sm:$0xff] %v784_v17 }
 0x6a4   : > { %1325 = shalt.err (!%p1322_p10)
}
 0x6a5   : > { %s1326_s16 = scalar_lea.hbm %s798_s20, 128  ;;  %s1330_s14 = scalar_lea.hbm %s1794_s7, 256 }
 0x6a6   : > { %p1327_p11 = scmp.ne.s32.totalorder %s798_s20, %s1326_s16  ;;  %p1331_p3 = scmp.lt.s32.totalorder %s798_s20, %s1794_s7 }
 0x6a7   : > { %p1332_p4 = scmp.lt.s32.totalorder %s1330_s14, %s1326_s16 }
 0x6a8   : > { %p1328_p13 = pnand %p1327_p11, %p1829_p1 }
 0x6a9   : > { %p1333_p12 = por %p1332_p4, %p1331_p3 }
 0x6aa   : > { %p1329_p6 = pneg %p1328_p13 }
 0x6ac   : > { %p1334_p0 = pnand %p1333_p12, %p1329_p6 }
 0x6ae   : > { %1337 = shalt.err (!%p1334_p0)
}
 0x6af   : > { %1063 = dma.vmem_to_hbm [thread:$0]  (%p1829_p1), %s801_s10, 128, %s798_s20, %s787_s21  }
 0x6b0 PF: > { %s812_s19 = sand.u32 1, %s1380_s24   ;;  %p1830_p2 = scmp.ne.s32.totalorder %s1809_s11, 0 }
 0x6b1   : > { %p1831_p5 = scmp.ge.s32.totalorder %s1392_s27, 2  ;;  %s813_s18 = scalar_lea.sflag [#allocation4], %s812_s19 }
 0x6b3   : > { %p1086_p8 = pnand %p1831_p5, %p1830_p2 }
 0x6b5   : > { %p1087_p9 = pneg %p1086_p8 }
 0x6b7   : > { %1375 = dma.done.wait (%p1087_p9), %s813_s18, 128  }
 0x6b8   : > { %1377 = vsyncadd (%p1087_p9), %s813_s18, 4294967168  ;;  %p20_p7 = scmp.ge.s32.totalorder %s1543_s13, 4   ;;  %s1832_s24 = smov %s1384_s25 }
 0x6b9   : > { %s1833_s25 = smov %s1388_s26  ;;  %s1834_s26 = smov %s1555_s28 }
 0x6ba   : > { %s1835_s27 = smov %s1543_s13  ;;  %22 = sbr.rel (!%p20_p7) target bundleno = 9 (0x9), region = 112 }
 0x6bf   :  { %818 = vsyncpa [#allocation3], 1 }
 0x6c0   :  { %820 = vsyncpa [#allocation3 + $0x1], 1 }
 0x6c1   :  { %821 = vsyncpa [#allocation6], 1 }
 0x6c2   :  { %822 = vsyncpa [#allocation10], 1 }
 0x6c3   :  { %823 = vsyncpa [#allocation4], 1 }
 0x6c4   :  { %825 = vsyncpa [#allocation4 + $0x1], 1 }

</bundles_post_ra>
